<compile_context>
chip_gen: v5e
topology: v5e:2x2
jax: 0.10.0
libtpu: 0.0.40
codegen_flags: <defaults>
</compile_context>

<pallas_src>
import math
import functools

import jax
import jax.numpy as jnp
from jax.experimental import pallas as pl
from jax.experimental.pallas import tpu as pltpu

_LANE = 128
_SUBLANE = 8


def _round_up(x, m):
    return (x + m - 1) // m * m


def _const_spec(shape):
    """BlockSpec for a block whose index never changes across the grid.

    Such blocks stay resident; single-buffer them when pl.Buffered is available
    (double-buffering a constant-index block is pure VMEM waste — matters most
    under v7x's 64 MiB VMEM)."""
    index_map = lambda *_: (0,) * len(shape)
    if hasattr(pl, "Buffered"):
        return pl.BlockSpec(shape, index_map, pipeline_mode=pl.Buffered(1))
    return pl.BlockSpec(shape, index_map)


def _seq_tile_candidates(S):
    cands = [t for t in (1024, 512, 256, 128) if t <= S and S % t == 0]
    return cands or [S]


def _vmem_limit(est_bytes):
    # Headroom above the estimate; clamp to a range valid on every generation
    # (v7x physical VMEM is 64 MiB per TensorCore).
    return int(min(64 << 20, max(32 << 20, est_bytes * 3 // 2)))


# --------------------------------------------------------------------------- #
# Linear projection kernel: y = x @ W + b  (W pre-transposed to [in, out]).
# --------------------------------------------------------------------------- #
def _linear_kernel(x_ref, w_ref, b_ref, o_ref):
    # One [ts, D_in] x [D_in, D_out] MXU matmul; bf16 operands, f32 accumulation,
    # bias added once in f32, result stored in bf16 (half-width K/V activations).
    y = jnp.dot(x_ref[0], w_ref[...], preferred_element_type=jnp.float32) + b_ref[...]
    o_ref[0] = y.astype(o_ref.dtype)


def _linear_vmem_bytes(ts, d_in, d_out, in_bytes, out_bytes):
    ts_p = _round_up(ts, _SUBLANE)
    din_p = _round_up(d_in, _LANE)
    dout_p = _round_up(d_out, _LANE)
    x_blk = 2 * ts_p * din_p * in_bytes                 # double-buffered input tile
    o_blk = 2 * ts_p * dout_p * out_bytes               # double-buffered output tile
    w_b = din_p * dout_p * 2 + _SUBLANE * dout_p * 4    # resident weight + bias
    live = ts_p * dout_p * 4                            # f32 accumulator value
    return x_blk + o_blk + w_b + live


def _linear(x, w, b, *, out_dtype=jnp.bfloat16):
    """x: [B, S, d_in] bf16, w: [d_in, d_out] bf16, b: [1, d_out] f32."""
    B, S, d_in = x.shape
    d_out = w.shape[1]
    ts = _seq_tile_candidates(S)[0]
    est = _linear_vmem_bytes(ts, d_in, d_out, x.dtype.itemsize,
                             jnp.dtype(out_dtype).itemsize)

    return pl.pallas_call(
        _linear_kernel,
        out_shape=jax.ShapeDtypeStruct((B, S, d_out), out_dtype),
        grid_spec=pltpu.PrefetchScalarGridSpec(
            num_scalar_prefetch=0,
            grid=(B, S // ts),
            in_specs=[
                pl.BlockSpec((1, ts, d_in), lambda bi, si: (bi, si, 0)),
                _const_spec((d_in, d_out)),
                _const_spec((1, d_out)),
            ],
            out_specs=pl.BlockSpec((1, ts, d_out), lambda bi, si: (bi, si, 0)),
        ),
        compiler_params=pltpu.CompilerParams(
            dimension_semantics=("parallel", "parallel"),
            vmem_limit_bytes=_vmem_limit(est)),
    )(x, w, b)


# --------------------------------------------------------------------------- #
# Flash-style attention + output projection.
# --------------------------------------------------------------------------- #
def _attn_kernel(q_ref, k_ref, v_ref, wo_ref, bo_ref, out_ref,
                 m_sc, l_sc, acc_sc, *, h):
    ki = pl.program_id(2)

    @pl.when(ki == 0)
    def _init():
        m_sc[...] = jnp.full(m_sc.shape, -jnp.inf, dtype=m_sc.dtype)
        l_sc[...] = jnp.zeros(l_sc.shape, dtype=l_sc.dtype)
        acc_sc[...] = jnp.zeros(acc_sc.shape, dtype=acc_sc.dtype)

    q = q_ref[0]   # [h, tq, d_k] bf16 (already scaled by 1/sqrt(d_k) via WQ)
    k = k_ref[0]   # [h, tk, d_k] bf16
    v = v_ref[0]   # [h, tk, d_k] bf16

    # Head-batched scores for this KV tile (f32 accumulation on the MXU).
    s = jnp.einsum("hqd,hkd->hqk", q, k,
                   preferred_element_type=jnp.float32)          # [h, tq, tk]

    m_prev = m_sc[...]                                          # [h, tq, 1]
    m_new = jnp.maximum(m_prev, jnp.max(s, axis=-1, keepdims=True))
    alpha = jnp.exp(m_prev - m_new)                             # f32 rescale factor
    # Softmax exp in bf16 (EUP throughput on v6e/v7x); row-sum kept in f32.
    p = jnp.exp((s - m_new).astype(jnp.bfloat16))               # [h, tq, tk] bf16
    # dropout(p=0.0) is the identity.
    l_sc[...] = alpha * l_sc[...] + jnp.sum(p.astype(jnp.float32), axis=-1,
                                            keepdims=True)
    acc_sc[...] = alpha * acc_sc[...] + jnp.einsum(
        "hqk,hkd->hqd", p, v, preferred_element_type=jnp.float32)
    m_sc[...] = m_new

    @pl.when(ki == pl.num_programs(2) - 1)
    def _finalize():
        # Deferred softmax normalization: one multiply on [h, tq, d_k] via the EUP
        # approximate reciprocal (error ~1e-3 relative; within the test tolerance).
        ctx = acc_sc[...] * pl.reciprocal(l_sc[...], approx=True)
        ctx = ctx.astype(jnp.bfloat16)                          # [h, tq, d_k]
        # Head merge folded into the output projection:
        #   out = concat_h(ctx_h) @ Wo  ==  sum_h ctx_h @ Wo[h]
        # (no in-kernel concat / lane reshape; Wo pre-reshaped to [h, d_k, D]).
        out = jnp.zeros(out_ref.shape[1:], jnp.float32)         # [tq, D]
        for i in range(h):
            out = out + jnp.dot(ctx[i], wo_ref[i],
                                preferred_element_type=jnp.float32)
        out_ref[0] = (out + bo_ref[...]).astype(out_ref.dtype)


def _attn_vmem_bytes(tq, tk, D, h, d_k, out_bytes):
    dk_p = _round_up(d_k, _LANE)
    d_p = _round_up(D, _LANE)
    tq_p = _round_up(tq, _SUBLANE)
    tk_p = _round_up(tk, _SUBLANE)
    q_blk = 2 * h * tq_p * dk_p * 2                      # double-buffered q tile
    kv_blk = 2 * 2 * h * tk_p * dk_p * 2                 # double-buffered k and v
    o_blk = 2 * tq_p * d_p * out_bytes                   # double-buffered output
    wo_b = h * _round_up(d_k, _SUBLANE) * d_p * 2 + _SUBLANE * d_p * 4
    scratch = 2 * h * tq_p * _LANE * 4 + h * tq_p * dk_p * 4     # m, l, acc
    live = 2 * h * tq_p * tk_p * 4 + h * tq_p * tk_p * 2         # scores f32 + p bf16
    return q_blk + kv_blk + o_blk + wo_b + scratch + live


def _choose_attention_tiles(Sq, Sk, D, h, d_k, out_bytes, budget_bytes=40 << 20):
    """Largest (tq, tk) whose estimated live VMEM fits the per-chip budget."""
    tqs = _seq_tile_candidates(Sq)
    tks = _seq_tile_candidates(Sk)
    for tq in tqs:                 # descending: prefer the largest q tile first
        for tk in tks:
            if _attn_vmem_bytes(tq, tk, D, h, d_k, out_bytes) <= budget_bytes:
                return tq, tk
    return tqs[-1], tks[-1]


def _flash_attention(q4, k4, v4, wo3, bo, *, h, d_k, out_dtype):
    """q4/k4/v4: [B, h, S, d_k] bf16 (q pre-scaled); wo3: [h, d_k, D]; bo: [1, D]."""
    B, _, Sq, _ = q4.shape
    Sk = k4.shape[2]
    D = h * d_k
    out_bytes = jnp.dtype(out_dtype).itemsize
    tq, tk = _choose_attention_tiles(Sq, Sk, D, h, d_k, out_bytes)
    est = _attn_vmem_bytes(tq, tk, D, h, d_k, out_bytes)

    kernel = functools.partial(_attn_kernel, h=h)

    return pl.pallas_call(
        kernel,
        out_shape=jax.ShapeDtypeStruct((B, Sq, D), out_dtype),
        grid_spec=pltpu.PrefetchScalarGridSpec(
            num_scalar_prefetch=0,
            grid=(B, Sq // tq, Sk // tk),          # kv axis innermost (reduction)
            in_specs=[
                pl.BlockSpec((1, h, tq, d_k), lambda b, qi, ki: (b, 0, qi, 0)),
                pl.BlockSpec((1, h, tk, d_k), lambda b, qi, ki: (b, 0, ki, 0)),
                pl.BlockSpec((1, h, tk, d_k), lambda b, qi, ki: (b, 0, ki, 0)),
                _const_spec((h, d_k, D)),
                _const_spec((1, D)),
            ],
            out_specs=pl.BlockSpec((1, tq, D), lambda b, qi, ki: (b, qi, 0)),
            scratch_shapes=[
                pltpu.VMEM((h, tq, 1), jnp.float32),     # running max m
                pltpu.VMEM((h, tq, 1), jnp.float32),     # running row-sum l
                pltpu.VMEM((h, tq, d_k), jnp.float32),   # un-normalized context
            ],
        ),
        compiler_params=pltpu.CompilerParams(
            dimension_semantics=("parallel", "parallel", "arbitrary"),
            vmem_limit_bytes=_vmem_limit(est)),
    )(q4, k4, v4, wo3, bo)


# --------------------------------------------------------------------------- #
# Wrapper (PyTorch-convention parameters).
# --------------------------------------------------------------------------- #
def multi_headed_attention(x_query, x_key, x_value, params, *, h):
    """x_*: [B, S, D] float32; params: PyTorch-convention weights/biases."""
    B, Sq, D = x_query.shape
    assert D % h == 0
    d_k = D // h
    scale = 1.0 / math.sqrt(d_k)

    # One-time weight prep: PyTorch Linear weights are [out, in]; transpose once to
    # [in, out] so every in-kernel projection is a plain `x @ W`.  Fold 1/sqrt(d_k)
    # into WQ / bq (no per-tile scale multiply inside the kernels).
    wq = (jnp.asarray(params["WQ_w"]).T * scale).astype(jnp.bfloat16)
    bq = (jnp.asarray(params["WQ_b"]) * scale).reshape(1, D).astype(jnp.float32)
    wk = jnp.asarray(params["WK_w"]).T.astype(jnp.bfloat16)
    bk = jnp.asarray(params["WK_b"]).reshape(1, D).astype(jnp.float32)
    wv = jnp.asarray(params["WV_w"]).T.astype(jnp.bfloat16)
    bv = jnp.asarray(params["WV_b"]).reshape(1, D).astype(jnp.float32)
    # Output projection weight pre-reshaped to [h, d_k, D]: folds the head merge
    # into h accumulated matmuls inside the attention kernel.
    wo3 = jnp.asarray(params["WO_w"]).T.reshape(h, d_k, D).astype(jnp.bfloat16)
    bo = jnp.asarray(params["WO_b"]).reshape(1, D).astype(jnp.float32)

    xq = x_query.astype(jnp.bfloat16)
    xk = x_key.astype(jnp.bfloat16)
    xv = x_value.astype(jnp.bfloat16)

    # Projections: each computed exactly once (hoisted out of the q-tile loop).
    q = _linear(xq, wq, bq)        # [B, Sq, D] bf16, pre-scaled
    k = _linear(xk, wk, bk)        # [B, Sk, D] bf16
    v = _linear(xv, wv, bv)        # [B, Sk, D] bf16
    Sk = k.shape[1]

    # Head split done once in the wrapper (plain XLA relayout, layout plumbing only)
    # so the attention kernel never slices/stacks/reshapes across lanes per step.
    q4 = q.reshape(B, Sq, h, d_k).transpose(0, 2, 1, 3)
    k4 = k.reshape(B, Sk, h, d_k).transpose(0, 2, 1, 3)
    v4 = v.reshape(B, Sk, h, d_k).transpose(0, 2, 1, 3)

    return _flash_attention(q4, k4, v4, wo3, bo, h=h, d_k=d_k,
                            out_dtype=x_query.dtype)


# --------------------------------------------------------------------------- #
# Pure-JAX f32 reference matching the PyTorch forward exactly.
# --------------------------------------------------------------------------- #
def _reference(x_query, x_key, x_value, params, *, h):
    B, S, D = x_query.shape
    d_k = D // h

    def lin(x, w, b):
        return x @ w.T + b

    q = lin(x_query, params["WQ_w"], params["WQ_b"]).reshape(B, -1, h, d_k).transpose(0, 2, 1, 3)
    k = lin(x_key, params["WK_w"], params["WK_b"]).reshape(B, -1, h, d_k).transpose(0, 2, 1, 3)
    v = lin(x_value, params["WV_w"], params["WV_b"]).reshape(B, -1, h, d_k).transpose(0, 2, 1, 3)

    scores = jnp.einsum("bhqd,bhkd->bhqk", q, k) / math.sqrt(d_k)
    p = jax.nn.softmax(scores, axis=-1)
    ctx = jnp.einsum("bhqk,bhkd->bhqd", p, v).transpose(0, 2, 1, 3).reshape(B, -1, D)
    return lin(ctx, params["WO_w"], params["WO_b"])


if __name__ == "__main__":
    # Small, deterministic problem: batch=2, seq=8, d_embed=32, h=4 heads.
    B, S, D, H = 2, 8, 32, 4

    key = jax.random.PRNGKey(0)
    keys = jax.random.split(key, 12)

    scale = 1.0 / math.sqrt(D)
    params = {
        "WQ_w": jax.random.uniform(keys[0], (D, D), jnp.float32, -scale, scale),
        "WQ_b": jax.random.uniform(keys[1], (D,), jnp.float32, -scale, scale),
        "WK_w": jax.random.uniform(keys[2], (D, D), jnp.float32, -scale, scale),
        "WK_b": jax.random.uniform(keys[3], (D,), jnp.float32, -scale, scale),
        "WV_w": jax.random.uniform(keys[4], (D, D), jnp.float32, -scale, scale),
        "WV_b": jax.random.uniform(keys[5], (D,), jnp.float32, -scale, scale),
        "WO_w": jax.random.uniform(keys[6], (D, D), jnp.float32, -scale, scale),
        "WO_b": jax.random.uniform(keys[7], (D,), jnp.float32, -scale, scale),
    }

    x_query = jax.random.normal(keys[8], (B, S, D), jnp.float32)
    x_key = jax.random.normal(keys[9], (B, S, D), jnp.float32)
    x_value = jax.random.normal(keys[10], (B, S, D), jnp.float32)

    out = multi_headed_attention(x_query, x_key, x_value, params, h=H)
    out = jax.block_until_ready(out)

    ref = _reference(x_query, x_key, x_value, params, h=H)
    assert out.shape == (B, S, D)
    # bf16 matmul operands / bf16 softmax exp / approx reciprocal (f32 accumulation)
    # -> looser tolerance than a pure-f32 reference.
    assert jnp.allclose(out, ref, atol=3e-2, rtol=3e-2), "mismatch vs reference"

    print("KERNEL_OK")
</pallas_src>

<mosaic_0001>
module attributes {stable_mosaic.version = 11 : i64} {
  func.func @_linear_kernel(%arg0: i32, %arg1: i32, %arg2: memref<1x8x32xbf16, #tpu.memory_space<vmem>>, %arg3: memref<32x32xbf16, #tpu.memory_space<vmem>>, %arg4: memref<1x32xf32, #tpu.memory_space<vmem>>, %arg5: memref<1x8x32xbf16, #tpu.memory_space<vmem>>) attributes {dimension_semantics = [#tpu.dimension_semantics<parallel>, #tpu.dimension_semantics<parallel>], iteration_bounds = array<i64: 2, 1>, scalar_prefetch = 0 : i64, scratch_operands = 0 : i64, tpu.core_type = #tpu.core_type<tc>, window_params = [{transform_indices = @transform_0, window_bounds = array<i64: 1, 8, 32>}, {pipeline_mode = #tpu.pipeline_mode<synchronous>, transform_indices = @transform_1, window_bounds = array<i64: 32, 32>}, {pipeline_mode = #tpu.pipeline_mode<synchronous>, transform_indices = @transform_2, window_bounds = array<i64: 1, 32>}, {transform_indices = @transform_3, window_bounds = array<i64: 1, 8, 32>}]} {
    %c0 = arith.constant 0 : index
    %c0_0 = arith.constant 0 : index
    %c0_1 = arith.constant 0 : index
    %0 = vector.load %arg2[%c0, %c0_0, %c0_1] : memref<1x8x32xbf16, #tpu.memory_space<vmem>>, vector<1x8x32xbf16>
    %1 = vector.shape_cast %0 : vector<1x8x32xbf16> to vector<8x32xbf16>
    %c0_2 = arith.constant 0 : index
    %c0_3 = arith.constant 0 : index
    %2 = vector.load %arg3[%c0_2, %c0_3] : memref<32x32xbf16, #tpu.memory_space<vmem>>, vector<32x32xbf16>
    %cst = arith.constant dense<0.000000e+00> : vector<8x32xf32>
    %3 = tpu.matmul %1, %2, %cst {dimension_numbers = #tpu.dot_dimension_numbers<[1], [0], [0], [1], [0, 0, 1, 1], [], []>} : vector<8x32xbf16>, vector<32x32xbf16>, vector<8x32xf32> -> vector<8x32xf32>
    %c0_4 = arith.constant 0 : index
    %c0_5 = arith.constant 0 : index
    %4 = vector.load %arg4[%c0_4, %c0_5] : memref<1x32xf32, #tpu.memory_space<vmem>>, vector<1x32xf32>
    %5 = vector.broadcast %4 : vector<1x32xf32> to vector<8x32xf32>
    %6 = arith.addf %3, %5 : vector<8x32xf32>
    %7 = arith.truncf %6 : vector<8x32xf32> to vector<8x32xbf16>
    %c0_6 = arith.constant 0 : index
    %c0_7 = arith.constant 0 : index
    %c0_8 = arith.constant 0 : index
    %8 = vector.load %arg5[%c0_6, %c0_7, %c0_8] : memref<1x8x32xbf16, #tpu.memory_space<vmem>>, vector<1x8x32xbf16>
    %9 = vector.shape_cast %8 : vector<1x8x32xbf16> to vector<8x32xbf16>
    %10 = vector.shape_cast %7 : vector<8x32xbf16> to vector<1x8x32xbf16>
    tpu.vector_store %arg5[%c0_6, %c0_7, %c0_8], %10 {strides = array<i32>} : memref<1x8x32xbf16, #tpu.memory_space<vmem>>, vector<1x8x32xbf16>,
    return
  }
  func.func @transform_0(%arg0: i32, %arg1: i32) -> (i32, i32, i32) {
    %c0_i32 = arith.constant 0 : i32
    %c0_i32_0 = arith.constant 0 : i32
    return %arg0, %arg1, %c0_i32 : i32, i32, i32
  }
  func.func @transform_1(%arg0: i32, %arg1: i32) -> (i32, i32) {
    %c0_i32 = arith.constant 0 : i32
    %c0_i32_0 = arith.constant 0 : i32
    %c0_i32_1 = arith.constant 0 : i32
    return %c0_i32, %c0_i32_0 : i32, i32
  }
  func.func @transform_2(%arg0: i32, %arg1: i32) -> (i32, i32) {
    %c0_i32 = arith.constant 0 : i32
    %c0_i32_0 = arith.constant 0 : i32
    %c0_i32_1 = arith.constant 0 : i32
    return %c0_i32, %c0_i32_0 : i32, i32
  }
  func.func @transform_3(%arg0: i32, %arg1: i32) -> (i32, i32, i32) {
    %c0_i32 = arith.constant 0 : i32
    %c0_i32_0 = arith.constant 0 : i32
    return %arg0, %arg1, %c0_i32 : i32, i32, i32
  }
}

</mosaic_0001>

<bundles_post_ra>
// kernel: tpu_custom_call.1
= control target key start
LH: loop header
LB: loop body
LE: loop exit
PB: predicated region body
PF: predicated region fallthrough
CT: control target
= control target key end

     0   :  { %8 = vsyncpa [#allocation3], 0  ;;  %s790_s0 = inlined_call_operand.hbm [shape: bf16[2,8,32], index: 0, kind: input, shape index: {}]   ;;  %s791_s1 = inlined_call_operand.hbm [shape: bf16[32,32], index: 1, kind: input, shape index: {}]   ;;  %s792_s2 = inlined_call_operand.vmem [shape: f32[1,32], index: 2, kind: input, shape index: {}]   ;;  %s793_s3 = inlined_call_operand.hbm [shape: bf16[2,8,32], index: 3, kind: output, shape index: {}]  }
   0x1   :  { %10 = vsyncpa [#allocation3 + $0x1], 0 }
   0x2   :  { %11 = vsyncpa [#allocation6], 0 }
   0x3   :  { %12 = vsyncpa [#allocation4], 0 }
   0x4   :  { %14 = vsyncpa [#allocation4 + $0x1], 0  ;;  %s644_s12 = smov 0   ;;  %s646_s13 = smov 0  }
   0x5   :  { %s648_s14 = smov 0   ;;  %s650_s15 = smov 0  }
   0x6   :  { %s652_s16 = smov 0   ;;  %s654_s17 = smov 0  }
   0x7 LB: > { %s371_s18 = sadd.s32 4294967295, %s619_s17   ;;  %p373_p0 = scmp.ge.s32.totalorder %s619_s17, 1  ;;  %s619_s17 = sphi %s654_s17, %s20_s17   ;;  %s615_s16 = sphi %s652_s16, %s804_s16   ;;  %s611_s15 = sphi %s650_s15, %s803_s15   ;;  %s607_s14 = sphi %s648_s14, %s802_s14   ;;  %s603_s13 = sphi %s646_s13, %s801_s13   ;;  %s599_s12 = sphi %s644_s12, %s800_s12  }
   0x8   : > { %p676_p1 = scmp.eq.s32.totalorder %s371_s18, 0  ;;  %p135_p2 = scmp.lt.s32.totalorder %s619_s17, 3 }
   0x9   : > { %s146_s22 = sshll.u32 %s791_s1, 4  ;;  %s621_s24 = smov [#allocation5]   ;;  %s147_s22 = int_to_ptr.hbm [resolvable:$true] %s146_s22 }
   0xa   : > { %p684_p3 = pnand %p373_p0, %p135_p2  ;;  %s148_s25 = sshll.u32 %s621_s24, 4  ;;  %s149_s25 = int_to_ptr.vmem [resolvable:$true] %s148_s25 }
   0xb   : > { %p375_p6 = scmp.ge.s32.totalorder %s619_s17, 2  ;;  %s622_s26 = smov 64  }
   0xc   : > { %p405_p4 = pneg %p684_p3  ;;  %s623_s27 = smov 4  }
   0xd   : > { %s372_s28 = sadd.s32 4294967294, %s619_s17   ;;  %s32_s29 = sadd.s32 1, %s615_s16 }
   0xe   : > { %p406_p5 = pnand %p405_p4, %p676_p1  ;;  %s41_s30 = sadd.s32 1, %s607_s14 }
   0xf   : > { %p34_p7 = scmp.ge.s32.totalorder %s32_s29, 2  ;;  %p48_p8 = scmp.ne.s32.totalorder %s607_s14, %s603_s13 }
  0x10   : > { %408 = dma.hbm_to_vmem [thread:$0]  (!%p406_p5), %s147_s22, 256, %s149_s25, [#allocation6], %s622_s26, %s622_s26, %s623_s27  }
  0x11   : > { %p49_p9 = scmp.eq.s32.totalorder %s619_s17, 0  ;;  %p54_p10 = scmp.ne.s32.totalorder %s603_s13, %s599_s12 }
  0x12   : > { %s806_s29 = smov (%p34_p7, %s32_s29), 0  ;;  %p122_p13 = scmp.eq.s32.totalorder %s371_s18, 1 }
  0x13   : > { %p703_p11 = por %p49_p9, %p48_p8  ;;  %p709_p12 = por %p676_p1, %p54_p10 }
  0x14   : > { %s36_s6 = ssub.s32 %s615_s16, %s806_s29  ;;  %p128_p2 = scmp.eq.s32.totalorder %s372_s28, 1 }
  0x15   : > { %p39_p0 = scmp.eq.s32.totalorder %s36_s6, 0  ;;  %p715_p4 = por %p122_p13, %p48_p8 }
  0x16   : > { %p418_p5 = scmp.lt.s32.totalorder %s619_s17, 2  ;;  %p723_p7 = por %p128_p2, %p54_p10 }
  0x17   : > { %s721_s8 = scalar_select %p39_p0, %s607_s14, %s41_s30  }
  0x18   : > { %s165_s10 = sand.u32 1, %s607_s14   ;;  %s377_s20 = sshll.u32 %s615_s16, 2 }
  0x19   : > { %s376_s11 = sshll.u32 %s165_s10, 2  ;;  %s174_s18 = scalar_lea.hbm %s790_s0, %s377_s20 }
  0x1a   : > { %s169_s24 = scalar_lea.vmem [#allocation2], %s376_s11  ;;  %s176_s26 = sshll.u32 %s174_s18, 4  ;;  %s177_s26 = int_to_ptr.hbm [resolvable:$true] %s176_s26 }
  0x1b   : > { %s178_s25 = sshll.u32 %s169_s24, 4  ;;  %p410_p8 = pnand %p418_p5, %p703_p11  ;;  %s179_s25 = int_to_ptr.vmem [resolvable:$true] %s178_s25 }
  0x1c   : > { %s166_s27 = scalar_lea.sflag [#allocation3], %s165_s10  ;;  %187 = sbr.rel (%p684_p3) target bundleno = 178 (0xb2), region = 32 }
  0x1d   : > { %412 = dma.hbm_to_vmem [thread:$0]  (!%p410_p8), %s177_s26, 64, %s179_s25, %s166_s27  }
  0x1e   : > { %s737_s28 = sand.u32 (!%p684_p3), 1, %s603_s13  }
  0x1f   : > { %s379_s30 = sshll.u32 (!%p684_p3), %s737_s28, 2  ;;  %s190_s6 = scalar_lea.sflag (!%p684_p3), [#allocation3], %s737_s28 }
  0x20   : > { %s193_s11 = scalar_lea.vmem (!%p684_p3), [#allocation2], %s379_s30 }
  0x21   : > { %586 = dma.done.wait (%p709_p12), %s190_s6, 64  }
  0x22   : > { %588 = vsyncadd (%p709_p12), %s190_s6, 4294967232 }
  0x23   : > { %590 = dma.done.wait (%p676_p1), [#allocation6], 256  }
  0x24   : > { %592 = vsyncadd (%p676_p1), [#allocation6], 4294967040  ;;  %v396_v0 = vld [vmem:[#allocation5 + $0x8] sm:$0xff]  ;;  %v395_v1 = vld [vmem:[#allocation5] sm:$0xff]  ;;  %vm244_vm0 = vcmask 261120   ;;  %s392_s23 = sshll.u32 %s611_s15, 2 }
  0x25   : > { %254 = vmatpush.bf16.msra.mxu0 %v396_v0  ;;  %v223_v2 = vld [vmem:[%s193_s11] sm:$0xf]  ;;  %s276_s21 = scalar_lea.hbm %s793_s3, %s392_s23  ;;  %s221_s19 = scalar_lea.vmem [#allocation7], %s379_s30  ;;  %vm262_vm1 = vcmask 257024  }
  0x26   : > { %v472_v3 = vld [vmem:[%s792_s2] ss:$0 sm:$0xff]  ;;  %s278_s22 = sshll.u32 %s221_s19, 4  ;;  %s280_s18 = sshll.u32 %s276_s21, 4  ;;  %s279_s22 = int_to_ptr.vmem [resolvable:$true] %s278_s22  ;;  %s281_s18 = int_to_ptr.hbm [resolvable:$true] %s280_s18 }
  0x27   : > { %s265_s15 = scalar_lea.sflag [#allocation4], %s737_s28  ;;  %s547_s24 = sshra.s32 %s281_s18, 4  ;;  %s548_s24 = int_to_ptr.hbm [resolvable:$true] %s547_s24 }
  0x28   : > { %s549_s25 = scalar_lea.hbm %s548_s24, 4  ;;  %s553_s30 = scalar_lea.hbm %s793_s3, 8 }
  0x29   : > { %255 = vmatpush.bf16.msra.mxu0 %v395_v1  ;;  %p550_p1 = scmp.ne.s32.totalorder %s548_s24, %s549_s25  ;;  %p554_p10 = scmp.lt.s32.totalorder %s548_s24, %s793_s3 }
  0x2a   : > { %p555_p11 = scmp.lt.s32.totalorder %s553_s30, %s549_s25 }
  0x2b   : > { %p551_p3 = pnand %p550_p1, %p715_p4 }
  0x2c   : > { %390 = vmatmul.msk.bf16.vlgmr.msra.gmra.mxu0 %vm244_vm0, %v223_v2  ;;  %p556_p12 = por %p555_p11, %p554_p10 }
  0x2d   : > { %p552_p9 = pneg %p551_p3 }
  0x2f   : > { %p557_p13 = pnand %p556_p12, %p552_p9 }
  0xa9   : > { %v257_v4 = vpop.f32.mrf.mxu0 }
  0xaa   : > { %v258_v5 = vadd.f32 %v472_v3, %v257_v4 }
  0xac   : > { %v261_v6 = vpack.c.bf16 %v258_v5, %v258_v5 }
  0xae   : > { %263 = vst.msk [vmem:[%s221_s19] sm:$0xf] %vm262_vm1, %v261_v6 }
  0xaf   : > { %560 = shalt.err (!%p557_p13)
}
  0xb0   : > { %403 = dma.vmem_to_hbm [thread:$0]  (%p715_p4), %s279_s22, 64, %s281_s18, %s265_s15  }
  0xb1   : > { %v259_v7 = vpop.f32.mrf.mxu0 }
  0xb2 PF: > { %s292_s28 = sand.u32 1, %s599_s12   ;;  %p414_p0 = pnand %p375_p6, %p723_p7 }
  0xb3   : > { %s293_s23 = scalar_lea.sflag [#allocation4], %s292_s28 }
  0xb4   : > { %p415_p2 = pneg %p414_p0 }
  0xb6   : > { %594 = dma.done.wait (%p415_p2), %s293_s23, 64  }
  0xb7   : > { %596 = vsyncadd (%p415_p2), %s293_s23, 4294967232  ;;  %s20_s17 = sadd.s32 1, %s619_s17   ;;  %s800_s12 = smov %s603_s13 }
  0xb8   : > { %p17_p5 = scmp.ge.s32.totalorder %s20_s17, 4   ;;  %s801_s13 = smov %s607_s14 }
  0xb9   : > { %s802_s14 = smov %s721_s8  ;;  %s803_s15 = smov %s615_s16 }
  0xba   : > { %s804_s16 = smov %s806_s29  ;;  %19 = sbr.rel (!%p17_p5) target bundleno = 7 (0x7), region = 81 }
  0xbf   :  { %299 = vsyncpa [#allocation3], 1 }
  0xc0   :  { %301 = vsyncpa [#allocation3 + $0x1], 1 }
  0xc1   :  { %302 = vsyncpa [#allocation6], 1 }
  0xc2   :  { %303 = vsyncpa [#allocation4], 1 }
  0xc3   :  { %305 = vsyncpa [#allocation4 + $0x1], 1 }

</bundles_post_ra>
